<compile_context>
chip_gen: v5e
topology: v5e:2x2
jax: 0.10.0
libtpu: 0.0.40
codegen_flags: <defaults>
</compile_context>

<pallas_src>
import jax
import jax.numpy as jnp
from jax import lax
from jax.experimental import pallas as pl
from jax.experimental.pallas import tpu as pltpu

K = 15          # self.kernel_size
PAD = 7         # self.padding
BN_EPS = 1e-5


def _basic_block_kernel(x_ref, w1_ref, w2_ref, g1_ref, b1_ref, g2_ref, b2_ref,
                        out_ref, xpad_ref, midpad_ref):
    # x_ref      : (N, Cin, L)  f32     input, PyTorch NCL layout (L on lanes)
    # w1_ref     : (Cp, K*Cin)  bf16    conv1 weight, column index = k*Cin + ci
    # w2_ref     : (Cp, K*Cp)   bf16    conv2 weight, column index = k*Cp  + ci
    # g*/b*      : (1, Cp, 1)   f32     BN affine params
    # out_ref    : (N, Cp, L)   f32
    # xpad_ref   : VMEM (N, Cin, L+2*PAD) bf16  scratch: padded input
    # midpad_ref : VMEM (N, Cp,  L+2*PAD) bf16  scratch: padded intermediate
    n, cin, l = x_ref.shape
    cp = w1_ref.shape[0]
    inv_cnt = 1.0 / float(n * l)
    dn = (((2,), (1,)), ((0,), (0,)))   # batched matmul: contract K*C, batch N

    # ---- pad input along L in VMEM: zero only the two PAD edges, bf16 ----
    xpad_ref[:, :, 0:PAD] = jnp.zeros((n, cin, PAD), jnp.bfloat16)
    xpad_ref[:, :, l + PAD:l + 2 * PAD] = jnp.zeros((n, cin, PAD), jnp.bfloat16)
    xpad_ref[:, :, PAD:PAD + l] = x_ref[...].astype(jnp.bfloat16)

    # ---- conv1: single im2col matmul, 120-deep contraction on the MXU ----
    # cols1[n, k*Cin + ci, l'] = xpad[n, ci, l' + k]
    cols1 = jnp.concatenate([xpad_ref[:, :, k:k + l] for k in range(K)], axis=1)
    w1b = jnp.broadcast_to(w1_ref[...][None, :, :], (n, cp, K * cin))
    acc1 = lax.dot_general(w1b, cols1, dn,
                           preferred_element_type=jnp.float32)   # (N, Cp, L) f32

    # ---- bn1: training-mode batch stats over (N, L), one-pass sum/sumsq ----
    s1 = jnp.sum(acc1, axis=(0, 2), keepdims=True)
    ss1 = jnp.sum(acc1 * acc1, axis=(0, 2), keepdims=True)
    mean1 = s1 * inv_cnt
    var1 = jnp.maximum(ss1 * inv_cnt - mean1 * mean1, 0.0)
    scale1 = lax.rsqrt(var1 + BN_EPS) * g1_ref[...]
    shift1 = b1_ref[...] - mean1 * scale1
    y = jnp.maximum(acc1 * scale1 + shift1, 0.0)                  # relu

    # ---- pad intermediate along L: edge-only zeros, interior store, bf16 ----
    midpad_ref[:, :, 0:PAD] = jnp.zeros((n, cp, PAD), jnp.bfloat16)
    midpad_ref[:, :, l + PAD:l + 2 * PAD] = jnp.zeros((n, cp, PAD), jnp.bfloat16)
    midpad_ref[:, :, PAD:PAD + l] = y.astype(jnp.bfloat16)

    # ---- conv2: single im2col matmul ----
    cols2 = jnp.concatenate([midpad_ref[:, :, k:k + l] for k in range(K)], axis=1)
    w2b = jnp.broadcast_to(w2_ref[...][None, :, :], (n, cp, K * cp))
    acc2 = lax.dot_general(w2b, cols2, dn,
                           preferred_element_type=jnp.float32)    # (N, Cp, L) f32

    # ---- bn2: one-pass stats ----
    s2 = jnp.sum(acc2, axis=(0, 2), keepdims=True)
    ss2 = jnp.sum(acc2 * acc2, axis=(0, 2), keepdims=True)
    mean2 = s2 * inv_cnt
    var2 = jnp.maximum(ss2 * inv_cnt - mean2 * mean2, 0.0)
    scale2 = lax.rsqrt(var2 + BN_EPS) * g2_ref[...]
    shift2 = b2_ref[...] - mean2 * scale2

    # ---- identity residual (stride=1, downsample=None) + relu ----
    # residual is re-loaded here so x is not live across the convs.
    out_ref[...] = jnp.maximum(acc2 * scale2 + shift2 + x_ref[...],
                               0.0).astype(out_ref.dtype)


@jax.jit
def basic_block_pallas(x_ncl, w1, w2, g1, b1, g2, b2):
    """x_ncl: (N, Cin, L); conv weights in PyTorch layout (Cout, Cin, K)."""
    n, cin, l = x_ncl.shape
    cp = w1.shape[0]
    assert cin == cp, "identity residual requires inplanes == planes"

    x32 = x_ncl.astype(jnp.float32)
    # Flatten weights so column index = k*Cin + ci, matching the im2col concat;
    # bf16 operands for native-MXU-rate matmuls (f32 accumulation in-kernel).
    w1_f = jnp.transpose(w1, (0, 2, 1)).reshape(cp, K * cin).astype(jnp.bfloat16)
    w2_f = jnp.transpose(w2, (0, 2, 1)).reshape(cp, K * cp).astype(jnp.bfloat16)
    g1b = g1.reshape(1, cp, 1).astype(jnp.float32)
    b1b = b1.reshape(1, cp, 1).astype(jnp.float32)
    g2b = g2.reshape(1, cp, 1).astype(jnp.float32)
    b2b = b2.reshape(1, cp, 1).astype(jnp.float32)

    full = lambda s: pl.BlockSpec(s, lambda i: (0,) * len(s))

    return pl.pallas_call(
        _basic_block_kernel,
        out_shape=jax.ShapeDtypeStruct((n, cp, l), jnp.float32),
        grid=(1,),   # single VMEM-resident step; global BN stats (see TODO above)
        in_specs=[
            full(x32.shape),
            full(w1_f.shape),
            full(w2_f.shape),
            full(g1b.shape),
            full(b1b.shape),
            full(g2b.shape),
            full(b2b.shape),
        ],
        out_specs=full((n, cp, l)),
        scratch_shapes=[
            pltpu.VMEM((n, cin, l + 2 * PAD), jnp.bfloat16),
            pltpu.VMEM((n, cp, l + 2 * PAD), jnp.bfloat16),
        ],
        compiler_params=pltpu.CompilerParams(
            dimension_semantics=("arbitrary",)),
    )(x32, w1_f, w2_f, g1b, b1b, g2b, b2b)


# ---------------- pure-JAX references (mirror the PyTorch forward) ----------------
def _conv1d_ref(x_ncl, w_oik):
    return lax.conv_general_dilated(
        x_ncl, w_oik, window_strides=(1,), padding=[(PAD, PAD)],
        dimension_numbers=("NCH", "OIH", "NCH"),
        preferred_element_type=jnp.float32)


def _bn_train_ref(y_ncl, g, b):
    mean = jnp.mean(y_ncl, axis=(0, 2), keepdims=True)
    var = jnp.mean((y_ncl - mean) ** 2, axis=(0, 2), keepdims=True)
    return (y_ncl - mean) * lax.rsqrt(var + BN_EPS) * g.reshape(1, -1, 1) \
        + b.reshape(1, -1, 1)


def basic_block_ref_f32(x, w1, w2, g1, b1, g2, b2):
    """Full-f32 reference (exactly the PyTorch module semantics)."""
    out = jnp.maximum(_bn_train_ref(_conv1d_ref(x, w1), g1, b1), 0.0)
    out = _bn_train_ref(_conv1d_ref(out, w2), g2, b2)
    return jnp.maximum(out + x, 0.0)


def basic_block_ref_matched(x, w1, w2, g1, b1, g2, b2):
    """Matched-precision reference: bf16 conv operands, f32 accumulation,
    mirroring the kernel's numerics (residual & BN in f32)."""
    w1b = w1.astype(jnp.bfloat16)
    w2b = w2.astype(jnp.bfloat16)
    out = _conv1d_ref(x.astype(jnp.bfloat16), w1b)
    out = jnp.maximum(_bn_train_ref(out, g1, b1), 0.0)
    out = _conv1d_ref(out.astype(jnp.bfloat16), w2b)
    out = _bn_train_ref(out, g2, b2)
    return jnp.maximum(out + x, 0.0)


if __name__ == "__main__":
    # small shapes: batch=2, inplanes=planes=8, seq length=32
    N, C, L = 2, 8, 32
    key = jax.random.PRNGKey(0)
    k_x, k_w1, k_w2, k_g1, k_b1, k_g2, k_b2 = jax.random.split(key, 7)

    x = jax.random.normal(k_x, (N, C, L), jnp.float32)
    w1 = jax.random.normal(k_w1, (C, C, K), jnp.float32) * 0.1   # conv1.weight
    w2 = jax.random.normal(k_w2, (C, C, K), jnp.float32) * 0.1   # conv2.weight
    g1 = 1.0 + 0.1 * jax.random.normal(k_g1, (C,), jnp.float32)  # bn1.weight
    b1 = 0.1 * jax.random.normal(k_b1, (C,), jnp.float32)        # bn1.bias
    g2 = 1.0 + 0.1 * jax.random.normal(k_g2, (C,), jnp.float32)  # bn2.weight
    b2 = 0.1 * jax.random.normal(k_b2, (C,), jnp.float32)        # bn2.bias

    out = basic_block_pallas(x, w1, w2, g1, b1, g2, b2)
    jax.block_until_ready(out)
    assert out.shape == (N, C, L)

    # Tight check vs a reference with the same bf16-operand / f32-accum numerics.
    ref_m = basic_block_ref_matched(x, w1, w2, g1, b1, g2, b2)
    err_m = float(jnp.max(jnp.abs(out - ref_m)))
    assert err_m < 2e-3, f"matched-precision mismatch: {err_m}"

    # Loose sanity check vs the full-f32 PyTorch-equivalent reference
    # (kernel intentionally uses bf16 MXU operands for ~3x MXU throughput).
    ref_f = basic_block_ref_f32(x, w1, w2, g1, b1, g2, b2)
    err_f = float(jnp.max(jnp.abs(out - ref_f)))
    assert err_f < 1e-1, f"f32-reference mismatch: {err_f}"

    print("KERNEL_OK")
</pallas_src>

<mosaic_0001>
module attributes {stable_mosaic.version = 11 : i64} {
  func.func @_basic_block_kernel(%arg0: i32, %arg1: memref<2x8x32xf32, #tpu.memory_space<vmem>>, %arg2: memref<8x120xbf16, #tpu.memory_space<vmem>>, %arg3: memref<8x120xbf16, #tpu.memory_space<vmem>>, %arg4: memref<1x8x1xf32, #tpu.memory_space<vmem>>, %arg5: memref<1x8x1xf32, #tpu.memory_space<vmem>>, %arg6: memref<1x8x1xf32, #tpu.memory_space<vmem>>, %arg7: memref<1x8x1xf32, #tpu.memory_space<vmem>>, %arg8: memref<2x8x32xf32, #tpu.memory_space<vmem>>, %arg9: memref<2x8x46xbf16, #tpu.memory_space<vmem>>, %arg10: memref<2x8x46xbf16, #tpu.memory_space<vmem>>) attributes {dimension_semantics = [#tpu.dimension_semantics<arbitrary>], iteration_bounds = array<i64: 1>, scalar_prefetch = 0 : i64, scratch_operands = 2 : i64, tpu.core_type = #tpu.core_type<tc>, window_params = [{pipeline_mode = #tpu.pipeline_mode<synchronous>, transform_indices = @transform_0, window_bounds = array<i64: 2, 8, 32>}, {pipeline_mode = #tpu.pipeline_mode<synchronous>, transform_indices = @transform_1, window_bounds = array<i64: 8, 120>}, {pipeline_mode = #tpu.pipeline_mode<synchronous>, transform_indices = @transform_2, window_bounds = array<i64: 8, 120>}, {pipeline_mode = #tpu.pipeline_mode<synchronous>, transform_indices = @transform_3, window_bounds = array<i64: 1, 8, 1>}, {pipeline_mode = #tpu.pipeline_mode<synchronous>, transform_indices = @transform_4, window_bounds = array<i64: 1, 8, 1>}, {pipeline_mode = #tpu.pipeline_mode<synchronous>, transform_indices = @transform_5, window_bounds = array<i64: 1, 8, 1>}, {pipeline_mode = #tpu.pipeline_mode<synchronous>, transform_indices = @transform_6, window_bounds = array<i64: 1, 8, 1>}, {pipeline_mode = #tpu.pipeline_mode<synchronous>, transform_indices = @transform_7, window_bounds = array<i64: 2, 8, 32>}]} {
    %cst = arith.constant 0.000000e+00 : bf16
    %0 = vector.broadcast %cst : bf16 to vector<2x8x7xbf16>
    %c0 = arith.constant 0 : index
    %c0_0 = arith.constant 0 : index
    %c0_1 = arith.constant 0 : index
    %1 = vector.load %arg9[%c0, %c0_0, %c0_1] : memref<2x8x46xbf16, #tpu.memory_space<vmem>>, vector<2x8x7xbf16>
    tpu.vector_store %arg9[%c0, %c0_0, %c0_1], %0 {strides = array<i32>} : memref<2x8x46xbf16, #tpu.memory_space<vmem>>, vector<2x8x7xbf16>,
    %cst_2 = arith.constant 0.000000e+00 : bf16
    %2 = vector.broadcast %cst_2 : bf16 to vector<2x8x7xbf16>
    %c0_3 = arith.constant 0 : index
    %c0_4 = arith.constant 0 : index
    %c39 = arith.constant 39 : index
    %3 = vector.load %arg9[%c0_3, %c0_4, %c39] : memref<2x8x46xbf16, #tpu.memory_space<vmem>>, vector<2x8x7xbf16>
    tpu.vector_store %arg9[%c0_3, %c0_4, %c39], %2 {strides = array<i32>} : memref<2x8x46xbf16, #tpu.memory_space<vmem>>, vector<2x8x7xbf16>,
    %c0_5 = arith.constant 0 : index
    %c0_6 = arith.constant 0 : index
    %c0_7 = arith.constant 0 : index
    %4 = vector.load %arg1[%c0_5, %c0_6, %c0_7] : memref<2x8x32xf32, #tpu.memory_space<vmem>>, vector<2x8x32xf32>
    %5 = arith.truncf %4 : vector<2x8x32xf32> to vector<2x8x32xbf16>
    %c0_8 = arith.constant 0 : index
    %c0_9 = arith.constant 0 : index
    %c7 = arith.constant 7 : index
    %6 = vector.load %arg9[%c0_8, %c0_9, %c7] : memref<2x8x46xbf16, #tpu.memory_space<vmem>>, vector<2x8x32xbf16>
    tpu.vector_store %arg9[%c0_8, %c0_9, %c7], %5 {strides = array<i32>} : memref<2x8x46xbf16, #tpu.memory_space<vmem>>, vector<2x8x32xbf16>,
    %c0_10 = arith.constant 0 : index
    %c0_11 = arith.constant 0 : index
    %c0_12 = arith.constant 0 : index
    %7 = vector.load %arg9[%c0_10, %c0_11, %c0_12] : memref<2x8x46xbf16, #tpu.memory_space<vmem>>, vector<2x8x32xbf16>
    %c0_13 = arith.constant 0 : index
    %c0_14 = arith.constant 0 : index
    %c1 = arith.constant 1 : index
    %8 = vector.load %arg9[%c0_13, %c0_14, %c1] : memref<2x8x46xbf16, #tpu.memory_space<vmem>>, vector<2x8x32xbf16>
    %c0_15 = arith.constant 0 : index
    %c0_16 = arith.constant 0 : index
    %c2 = arith.constant 2 : index
    %9 = vector.load %arg9[%c0_15, %c0_16, %c2] : memref<2x8x46xbf16, #tpu.memory_space<vmem>>, vector<2x8x32xbf16>
    %c0_17 = arith.constant 0 : index
    %c0_18 = arith.constant 0 : index
    %c3 = arith.constant 3 : index
    %10 = vector.load %arg9[%c0_17, %c0_18, %c3] : memref<2x8x46xbf16, #tpu.memory_space<vmem>>, vector<2x8x32xbf16>
    %c0_19 = arith.constant 0 : index
    %c0_20 = arith.constant 0 : index
    %c4 = arith.constant 4 : index
    %11 = vector.load %arg9[%c0_19, %c0_20, %c4] : memref<2x8x46xbf16, #tpu.memory_space<vmem>>, vector<2x8x32xbf16>
    %c0_21 = arith.constant 0 : index
    %c0_22 = arith.constant 0 : index
    %c5 = arith.constant 5 : index
    %12 = vector.load %arg9[%c0_21, %c0_22, %c5] : memref<2x8x46xbf16, #tpu.memory_space<vmem>>, vector<2x8x32xbf16>
    %c0_23 = arith.constant 0 : index
    %c0_24 = arith.constant 0 : index
    %c6 = arith.constant 6 : index
    %13 = vector.load %arg9[%c0_23, %c0_24, %c6] : memref<2x8x46xbf16, #tpu.memory_space<vmem>>, vector<2x8x32xbf16>
    %c0_25 = arith.constant 0 : index
    %c0_26 = arith.constant 0 : index
    %c7_27 = arith.constant 7 : index
    %14 = vector.load %arg9[%c0_25, %c0_26, %c7_27] : memref<2x8x46xbf16, #tpu.memory_space<vmem>>, vector<2x8x32xbf16>
    %c0_28 = arith.constant 0 : index
    %c0_29 = arith.constant 0 : index
    %c8 = arith.constant 8 : index
    %15 = vector.load %arg9[%c0_28, %c0_29, %c8] : memref<2x8x46xbf16, #tpu.memory_space<vmem>>, vector<2x8x32xbf16>
    %c0_30 = arith.constant 0 : index
    %c0_31 = arith.constant 0 : index
    %c9 = arith.constant 9 : index
    %16 = vector.load %arg9[%c0_30, %c0_31, %c9] : memref<2x8x46xbf16, #tpu.memory_space<vmem>>, vector<2x8x32xbf16>
    %c0_32 = arith.constant 0 : index
    %c0_33 = arith.constant 0 : index
    %c10 = arith.constant 10 : index
    %17 = vector.load %arg9[%c0_32, %c0_33, %c10] : memref<2x8x46xbf16, #tpu.memory_space<vmem>>, vector<2x8x32xbf16>
    %c0_34 = arith.constant 0 : index
    %c0_35 = arith.constant 0 : index
    %c11 = arith.constant 11 : index
    %18 = vector.load %arg9[%c0_34, %c0_35, %c11] : memref<2x8x46xbf16, #tpu.memory_space<vmem>>, vector<2x8x32xbf16>
    %c0_36 = arith.constant 0 : index
    %c0_37 = arith.constant 0 : index
    %c12 = arith.constant 12 : index
    %19 = vector.load %arg9[%c0_36, %c0_37, %c12] : memref<2x8x46xbf16, #tpu.memory_space<vmem>>, vector<2x8x32xbf16>
    %c0_38 = arith.constant 0 : index
    %c0_39 = arith.constant 0 : index
    %c13 = arith.constant 13 : index
    %20 = vector.load %arg9[%c0_38, %c0_39, %c13] : memref<2x8x46xbf16, #tpu.memory_space<vmem>>, vector<2x8x32xbf16>
    %c0_40 = arith.constant 0 : index
    %c0_41 = arith.constant 0 : index
    %c14 = arith.constant 14 : index
    %21 = vector.load %arg9[%c0_40, %c0_41, %c14] : memref<2x8x46xbf16, #tpu.memory_space<vmem>>, vector<2x8x32xbf16>
    %22 = tpu.concatenate %7, %8, %9, %10, %11, %12, %13, %14, %15, %16, %17, %18, %19, %20, %21 in 1 : vector<2x8x32xbf16>, vector<2x8x32xbf16>, vector<2x8x32xbf16>, vector<2x8x32xbf16>, vector<2x8x32xbf16>, vector<2x8x32xbf16>, vector<2x8x32xbf16>, vector<2x8x32xbf16>, vector<2x8x32xbf16>, vector<2x8x32xbf16>, vector<2x8x32xbf16>, vector<2x8x32xbf16>, vector<2x8x32xbf16>, vector<2x8x32xbf16>, vector<2x8x32xbf16> -> vector<2x120x32xbf16>
    %c0_42 = arith.constant 0 : index
    %c0_43 = arith.constant 0 : index
    %23 = vector.load %arg2[%c0_42, %c0_43] : memref<8x120xbf16, #tpu.memory_space<vmem>>, vector<8x120xbf16>
    %24 = vector.shape_cast %23 : vector<8x120xbf16> to vector<1x8x120xbf16>
    %25 = vector.shape_cast %24 : vector<1x8x120xbf16> to vector<1x8x120xbf16>
    %26 = vector.broadcast %25 : vector<1x8x120xbf16> to vector<2x8x120xbf16>
    %cst_44 = arith.constant dense<0.000000e+00> : vector<2x8x32xf32>
    %27 = tpu.matmul %26, %22, %cst_44 {dimension_numbers = #tpu.dot_dimension_numbers<[2], [1], [1], [2], [0, 0, 0, 1, 1, 2], [0], [0]>} : vector<2x8x120xbf16>, vector<2x120x32xbf16>, vector<2x8x32xf32> -> vector<2x8x32xf32>
    %cst_45 = arith.constant dense<0.000000e+00> : vector<8xf32>
    %28 = vector.multi_reduction <add>, %27, %cst_45 [0, 2] : vector<2x8x32xf32> to vector<8xf32>
    %29 = vector.shape_cast %28 : vector<8xf32> to vector<1x8x1xf32>
    %30 = arith.mulf %27, %27 : vector<2x8x32xf32>
    %cst_46 = arith.constant dense<0.000000e+00> : vector<8xf32>
    %31 = vector.multi_reduction <add>, %30, %cst_46 [0, 2] : vector<2x8x32xf32> to vector<8xf32>
    %32 = vector.shape_cast %31 : vector<8xf32> to vector<1x8x1xf32>
    %cst_47 = arith.constant 1.562500e-02 : f32
    %33 = vector.broadcast %cst_47 : f32 to vector<1x8x1xf32>
    %34 = arith.mulf %29, %33 : vector<1x8x1xf32>
    %cst_48 = arith.constant 1.562500e-02 : f32
    %35 = vector.broadcast %cst_48 : f32 to vector<1x8x1xf32>
    %36 = arith.mulf %32, %35 : vector<1x8x1xf32>
    %37 = arith.mulf %34, %34 : vector<1x8x1xf32>
    %38 = arith.subf %36, %37 : vector<1x8x1xf32>
    %cst_49 = arith.constant 0.000000e+00 : f32
    %39 = vector.broadcast %cst_49 : f32 to vector<1x8x1xf32>
    %40 = arith.maximumf %38, %39 : vector<1x8x1xf32>
    %cst_50 = arith.constant 9.99999974E-6 : f32
    %41 = vector.broadcast %cst_50 : f32 to vector<1x8x1xf32>
    %42 = arith.addf %40, %41 : vector<1x8x1xf32>
    %43 = math.rsqrt %42 : vector<1x8x1xf32>
    %c0_51 = arith.constant 0 : index
    %c0_52 = arith.constant 0 : index
    %c0_53 = arith.constant 0 : index
    %44 = vector.load %arg4[%c0_51, %c0_52, %c0_53] : memref<1x8x1xf32, #tpu.memory_space<vmem>>, vector<1x8x1xf32>
    %45 = arith.mulf %43, %44 : vector<1x8x1xf32>
    %c0_54 = arith.constant 0 : index
    %c0_55 = arith.constant 0 : index
    %c0_56 = arith.constant 0 : index
    %46 = vector.load %arg5[%c0_54, %c0_55, %c0_56] : memref<1x8x1xf32, #tpu.memory_space<vmem>>, vector<1x8x1xf32>
    %47 = arith.mulf %34, %45 : vector<1x8x1xf32>
    %48 = arith.subf %46, %47 : vector<1x8x1xf32>
    %49 = vector.broadcast %45 : vector<1x8x1xf32> to vector<2x8x32xf32>
    %50 = arith.mulf %27, %49 : vector<2x8x32xf32>
    %51 = vector.broadcast %48 : vector<1x8x1xf32> to vector<2x8x32xf32>
    %52 = arith.addf %50, %51 : vector<2x8x32xf32>
    %cst_57 = arith.constant 0.000000e+00 : f32
    %53 = vector.broadcast %cst_57 : f32 to vector<2x8x32xf32>
    %54 = arith.maximumf %52, %53 : vector<2x8x32xf32>
    %cst_58 = arith.constant 0.000000e+00 : bf16
    %55 = vector.broadcast %cst_58 : bf16 to vector<2x8x7xbf16>
    %c0_59 = arith.constant 0 : index
    %c0_60 = arith.constant 0 : index
    %c0_61 = arith.constant 0 : index
    %56 = vector.load %arg10[%c0_59, %c0_60, %c0_61] : memref<2x8x46xbf16, #tpu.memory_space<vmem>>, vector<2x8x7xbf16>
    tpu.vector_store %arg10[%c0_59, %c0_60, %c0_61], %55 {strides = array<i32>} : memref<2x8x46xbf16, #tpu.memory_space<vmem>>, vector<2x8x7xbf16>,
    %cst_62 = arith.constant 0.000000e+00 : bf16
    %57 = vector.broadcast %cst_62 : bf16 to vector<2x8x7xbf16>
    %c0_63 = arith.constant 0 : index
    %c0_64 = arith.constant 0 : index
    %c39_65 = arith.constant 39 : index
    %58 = vector.load %arg10[%c0_63, %c0_64, %c39_65] : memref<2x8x46xbf16, #tpu.memory_space<vmem>>, vector<2x8x7xbf16>
    tpu.vector_store %arg10[%c0_63, %c0_64, %c39_65], %57 {strides = array<i32>} : memref<2x8x46xbf16, #tpu.memory_space<vmem>>, vector<2x8x7xbf16>,
    %59 = arith.truncf %54 : vector<2x8x32xf32> to vector<2x8x32xbf16>
    %c0_66 = arith.constant 0 : index
    %c0_67 = arith.constant 0 : index
    %c7_68 = arith.constant 7 : index
    %60 = vector.load %arg10[%c0_66, %c0_67, %c7_68] : memref<2x8x46xbf16, #tpu.memory_space<vmem>>, vector<2x8x32xbf16>
    tpu.vector_store %arg10[%c0_66, %c0_67, %c7_68], %59 {strides = array<i32>} : memref<2x8x46xbf16, #tpu.memory_space<vmem>>, vector<2x8x32xbf16>,
    %c0_69 = arith.constant 0 : index
    %c0_70 = arith.constant 0 : index
    %c0_71 = arith.constant 0 : index
    %61 = vector.load %arg10[%c0_69, %c0_70, %c0_71] : memref<2x8x46xbf16, #tpu.memory_space<vmem>>, vector<2x8x32xbf16>
    %c0_72 = arith.constant 0 : index
    %c0_73 = arith.constant 0 : index
    %c1_74 = arith.constant 1 : index
    %62 = vector.load %arg10[%c0_72, %c0_73, %c1_74] : memref<2x8x46xbf16, #tpu.memory_space<vmem>>, vector<2x8x32xbf16>
    %c0_75 = arith.constant 0 : index
    %c0_76 = arith.constant 0 : index
    %c2_77 = arith.constant 2 : index
    %63 = vector.load %arg10[%c0_75, %c0_76, %c2_77] : memref<2x8x46xbf16, #tpu.memory_space<vmem>>, vector<2x8x32xbf16>
    %c0_78 = arith.constant 0 : index
    %c0_79 = arith.constant 0 : index
    %c3_80 = arith.constant 3 : index
    %64 = vector.load %arg10[%c0_78, %c0_79, %c3_80] : memref<2x8x46xbf16, #tpu.memory_space<vmem>>, vector<2x8x32xbf16>
    %c0_81 = arith.constant 0 : index
    %c0_82 = arith.constant 0 : index
    %c4_83 = arith.constant 4 : index
    %65 = vector.load %arg10[%c0_81, %c0_82, %c4_83] : memref<2x8x46xbf16, #tpu.memory_space<vmem>>, vector<2x8x32xbf16>
    %c0_84 = arith.constant 0 : index
    %c0_85 = arith.constant 0 : index
    %c5_86 = arith.constant 5 : index
    %66 = vector.load %arg10[%c0_84, %c0_85, %c5_86] : memref<2x8x46xbf16, #tpu.memory_space<vmem>>, vector<2x8x32xbf16>
    %c0_87 = arith.constant 0 : index
    %c0_88 = arith.constant 0 : index
    %c6_89 = arith.constant 6 : index
    %67 = vector.load %arg10[%c0_87, %c0_88, %c6_89] : memref<2x8x46xbf16, #tpu.memory_space<vmem>>, vector<2x8x32xbf16>
    %c0_90 = arith.constant 0 : index
    %c0_91 = arith.constant 0 : index
    %c7_92 = arith.constant 7 : index
    %68 = vector.load %arg10[%c0_90, %c0_91, %c7_92] : memref<2x8x46xbf16, #tpu.memory_space<vmem>>, vector<2x8x32xbf16>
    %c0_93 = arith.constant 0 : index
    %c0_94 = arith.constant 0 : index
    %c8_95 = arith.constant 8 : index
    %69 = vector.load %arg10[%c0_93, %c0_94, %c8_95] : memref<2x8x46xbf16, #tpu.memory_space<vmem>>, vector<2x8x32xbf16>
    %c0_96 = arith.constant 0 : index
    %c0_97 = arith.constant 0 : index
    %c9_98 = arith.constant 9 : index
    %70 = vector.load %arg10[%c0_96, %c0_97, %c9_98] : memref<2x8x46xbf16, #tpu.memory_space<vmem>>, vector<2x8x32xbf16>
    %c0_99 = arith.constant 0 : index
    %c0_100 = arith.constant 0 : index
    %c10_101 = arith.constant 10 : index
    %71 = vector.load %arg10[%c0_99, %c0_100, %c10_101] : memref<2x8x46xbf16, #tpu.memory_space<vmem>>, vector<2x8x32xbf16>
    %c0_102 = arith.constant 0 : index
    %c0_103 = arith.constant 0 : index
    %c11_104 = arith.constant 11 : index
    %72 = vector.load %arg10[%c0_102, %c0_103, %c11_104] : memref<2x8x46xbf16, #tpu.memory_space<vmem>>, vector<2x8x32xbf16>
    %c0_105 = arith.constant 0 : index
    %c0_106 = arith.constant 0 : index
    %c12_107 = arith.constant 12 : index
    %73 = vector.load %arg10[%c0_105, %c0_106, %c12_107] : memref<2x8x46xbf16, #tpu.memory_space<vmem>>, vector<2x8x32xbf16>
    %c0_108 = arith.constant 0 : index
    %c0_109 = arith.constant 0 : index
    %c13_110 = arith.constant 13 : index
    %74 = vector.load %arg10[%c0_108, %c0_109, %c13_110] : memref<2x8x46xbf16, #tpu.memory_space<vmem>>, vector<2x8x32xbf16>
    %c0_111 = arith.constant 0 : index
    %c0_112 = arith.constant 0 : index
    %c14_113 = arith.constant 14 : index
    %75 = vector.load %arg10[%c0_111, %c0_112, %c14_113] : memref<2x8x46xbf16, #tpu.memory_space<vmem>>, vector<2x8x32xbf16>
    %76 = tpu.concatenate %61, %62, %63, %64, %65, %66, %67, %68, %69, %70, %71, %72, %73, %74, %75 in 1 : vector<2x8x32xbf16>, vector<2x8x32xbf16>, vector<2x8x32xbf16>, vector<2x8x32xbf16>, vector<2x8x32xbf16>, vector<2x8x32xbf16>, vector<2x8x32xbf16>, vector<2x8x32xbf16>, vector<2x8x32xbf16>, vector<2x8x32xbf16>, vector<2x8x32xbf16>, vector<2x8x32xbf16>, vector<2x8x32xbf16>, vector<2x8x32xbf16>, vector<2x8x32xbf16> -> vector<2x120x32xbf16>
    %c0_114 = arith.constant 0 : index
    %c0_115 = arith.constant 0 : index
    %77 = vector.load %arg3[%c0_114, %c0_115] : memref<8x120xbf16, #tpu.memory_space<vmem>>, vector<8x120xbf16>
    %78 = vector.shape_cast %77 : vector<8x120xbf16> to vector<1x8x120xbf16>
    %79 = vector.shape_cast %78 : vector<1x8x120xbf16> to vector<1x8x120xbf16>
    %80 = vector.broadcast %79 : vector<1x8x120xbf16> to vector<2x8x120xbf16>
    %cst_116 = arith.constant dense<0.000000e+00> : vector<2x8x32xf32>
    %81 = tpu.matmul %80, %76, %cst_116 {dimension_numbers = #tpu.dot_dimension_numbers<[2], [1], [1], [2], [0, 0, 0, 1, 1, 2], [0], [0]>} : vector<2x8x120xbf16>, vector<2x120x32xbf16>, vector<2x8x32xf32> -> vector<2x8x32xf32>
    %cst_117 = arith.constant dense<0.000000e+00> : vector<8xf32>
    %82 = vector.multi_reduction <add>, %81, %cst_117 [0, 2] : vector<2x8x32xf32> to vector<8xf32>
    %83 = vector.shape_cast %82 : vector<8xf32> to vector<1x8x1xf32>
    %84 = arith.mulf %81, %81 : vector<2x8x32xf32>
    %cst_118 = arith.constant dense<0.000000e+00> : vector<8xf32>
    %85 = vector.multi_reduction <add>, %84, %cst_118 [0, 2] : vector<2x8x32xf32> to vector<8xf32>
    %86 = vector.shape_cast %85 : vector<8xf32> to vector<1x8x1xf32>
    %cst_119 = arith.constant 1.562500e-02 : f32
    %87 = vector.broadcast %cst_119 : f32 to vector<1x8x1xf32>
    %88 = arith.mulf %83, %87 : vector<1x8x1xf32>
    %cst_120 = arith.constant 1.562500e-02 : f32
    %89 = vector.broadcast %cst_120 : f32 to vector<1x8x1xf32>
    %90 = arith.mulf %86, %89 : vector<1x8x1xf32>
    %91 = arith.mulf %88, %88 : vector<1x8x1xf32>
    %92 = arith.subf %90, %91 : vector<1x8x1xf32>
    %cst_121 = arith.constant 0.000000e+00 : f32
    %93 = vector.broadcast %cst_121 : f32 to vector<1x8x1xf32>
    %94 = arith.maximumf %92, %93 : vector<1x8x1xf32>
    %cst_122 = arith.constant 9.99999974E-6 : f32
    %95 = vector.broadcast %cst_122 : f32 to vector<1x8x1xf32>
    %96 = arith.addf %94, %95 : vector<1x8x1xf32>
    %97 = math.rsqrt %96 : vector<1x8x1xf32>
    %c0_123 = arith.constant 0 : index
    %c0_124 = arith.constant 0 : index
    %c0_125 = arith.constant 0 : index
    %98 = vector.load %arg6[%c0_123, %c0_124, %c0_125] : memref<1x8x1xf32, #tpu.memory_space<vmem>>, vector<1x8x1xf32>
    %99 = arith.mulf %97, %98 : vector<1x8x1xf32>
    %c0_126 = arith.constant 0 : index
    %c0_127 = arith.constant 0 : index
    %c0_128 = arith.constant 0 : index
    %100 = vector.load %arg7[%c0_126, %c0_127, %c0_128] : memref<1x8x1xf32, #tpu.memory_space<vmem>>, vector<1x8x1xf32>
    %101 = arith.mulf %88, %99 : vector<1x8x1xf32>
    %102 = arith.subf %100, %101 : vector<1x8x1xf32>
    %103 = vector.broadcast %99 : vector<1x8x1xf32> to vector<2x8x32xf32>
    %104 = arith.mulf %81, %103 : vector<2x8x32xf32>
    %105 = vector.broadcast %102 : vector<1x8x1xf32> to vector<2x8x32xf32>
    %106 = arith.addf %104, %105 : vector<2x8x32xf32>
    %c0_129 = arith.constant 0 : index
    %c0_130 = arith.constant 0 : index
    %c0_131 = arith.constant 0 : index
    %107 = vector.load %arg1[%c0_129, %c0_130, %c0_131] : memref<2x8x32xf32, #tpu.memory_space<vmem>>, vector<2x8x32xf32>
    %108 = arith.addf %106, %107 : vector<2x8x32xf32>
    %cst_132 = arith.constant 0.000000e+00 : f32
    %109 = vector.broadcast %cst_132 : f32 to vector<2x8x32xf32>
    %110 = arith.maximumf %108, %109 : vector<2x8x32xf32>
    %c0_133 = arith.constant 0 : index
    %c0_134 = arith.constant 0 : index
    %c0_135 = arith.constant 0 : index
    %111 = vector.load %arg8[%c0_133, %c0_134, %c0_135] : memref<2x8x32xf32, #tpu.memory_space<vmem>>, vector<2x8x32xf32>
    tpu.vector_store %arg8[%c0_133, %c0_134, %c0_135], %110 {strides = array<i32>} : memref<2x8x32xf32, #tpu.memory_space<vmem>>, vector<2x8x32xf32>,
    return
  }
  func.func @transform_0(%arg0: i32) -> (i32, i32, i32) {
    %c0_i32 = arith.constant 0 : i32
    %c0_i32_0 = arith.constant 0 : i32
    %c0_i32_1 = arith.constant 0 : i32
    %c0_i32_2 = arith.constant 0 : i32
    return %c0_i32, %c0_i32_0, %c0_i32_1 : i32, i32, i32
  }
  func.func @transform_1(%arg0: i32) -> (i32, i32) {
    %c0_i32 = arith.constant 0 : i32
    %c0_i32_0 = arith.constant 0 : i32
    %c0_i32_1 = arith.constant 0 : i32
    return %c0_i32, %c0_i32_0 : i32, i32
  }
  func.func @transform_2(%arg0: i32) -> (i32, i32) {
    %c0_i32 = arith.constant 0 : i32
    %c0_i32_0 = arith.constant 0 : i32
    %c0_i32_1 = arith.constant 0 : i32
    return %c0_i32, %c0_i32_0 : i32, i32
  }
  func.func @transform_3(%arg0: i32) -> (i32, i32, i32) {
    %c0_i32 = arith.constant 0 : i32
    %c0_i32_0 = arith.constant 0 : i32
    %c0_i32_1 = arith.constant 0 : i32
    %c0_i32_2 = arith.constant 0 : i32
    return %c0_i32, %c0_i32_0, %c0_i32_1 : i32, i32, i32
  }
  func.func @transform_4(%arg0: i32) -> (i32, i32, i32) {
    %c0_i32 = arith.constant 0 : i32
    %c0_i32_0 = arith.constant 0 : i32
    %c0_i32_1 = arith.constant 0 : i32
    %c0_i32_2 = arith.constant 0 : i32
    return %c0_i32, %c0_i32_0, %c0_i32_1 : i32, i32, i32
  }
  func.func @transform_5(%arg0: i32) -> (i32, i32, i32) {
    %c0_i32 = arith.constant 0 : i32
    %c0_i32_0 = arith.constant 0 : i32
    %c0_i32_1 = arith.constant 0 : i32
    %c0_i32_2 = arith.constant 0 : i32
    return %c0_i32, %c0_i32_0, %c0_i32_1 : i32, i32, i32
  }
  func.func @transform_6(%arg0: i32) -> (i32, i32, i32) {
    %c0_i32 = arith.constant 0 : i32
    %c0_i32_0 = arith.constant 0 : i32
    %c0_i32_1 = arith.constant 0 : i32
    %c0_i32_2 = arith.constant 0 : i32
    return %c0_i32, %c0_i32_0, %c0_i32_1 : i32, i32, i32
  }
  func.func @transform_7(%arg0: i32) -> (i32, i32, i32) {
    %c0_i32 = arith.constant 0 : i32
    %c0_i32_0 = arith.constant 0 : i32
    %c0_i32_1 = arith.constant 0 : i32
    %c0_i32_2 = arith.constant 0 : i32
    return %c0_i32, %c0_i32_0, %c0_i32_1 : i32, i32, i32
  }
}

</mosaic_0001>

<bundles_post_ra>
// kernel: basic_block_pallas.1
= control target key start
LH: loop header
LB: loop body
LE: loop exit
PB: predicated region body
PF: predicated region fallthrough
CT: control target
= control target key end

     0   :  { %s779_s0 = inlined_call_operand.vmem [shape: f32[2,8,32], index: 0, kind: input, shape index: {}]   ;;  %s780_s1 = inlined_call_operand.vmem [shape: bf16[8,120], index: 1, kind: input, shape index: {}]   ;;  %s781_s2 = inlined_call_operand.vmem [shape: bf16[8,120], index: 2, kind: input, shape index: {}]   ;;  %s782_s3 = inlined_call_operand.vmem [shape: f32[1,8,1], index: 3, kind: input, shape index: {}]   ;;  %s783_s4 = inlined_call_operand.vmem [shape: f32[1,8,1], index: 4, kind: input, shape index: {}]   ;;  %s784_s5 = inlined_call_operand.vmem [shape: f32[1,8,1], index: 5, kind: input, shape index: {}]   ;;  %s785_s6 = inlined_call_operand.vmem [shape: f32[1,8,1], index: 6, kind: input, shape index: {}]   ;;  %s786_s7 = inlined_call_operand.hbm [shape: f32[2,8,32], index: 7, kind: output, shape index: {}]  }
   0x1   :  { %v619_v0 = vld [vmem:[%s779_s0] sm:$0xff] }
   0x2   :  { %12 = vsyncpa [#allocation5], 0  ;;  %v36_v1 = vpack.c.bf16 %v619_v0, %v619_v0  ;;  %s557_s26 = smov 7   ;;  %v627_v2 = vld [vmem:[%s779_s0 + $0x8] sm:$0xff]  ;;  %vm28_vm0 = vcmask 52224   ;;  %v558_v4 = vmov 0  }
   0x3   :  { %v37_v3 = vpack.c.bf16 %v627_v2, %v627_v2  ;;  %29 = vst.msk [vmem:[#allocation2] sm:$0xf] %vm28_vm0, %v558_v4  ;;  %vm31_vm1 = vcmask 372024   ;;  %525 = vset.pattern.permute.xlu2 %v558_v4  ;;  %526 = vset.pattern.permute.xlu0 %v558_v4  ;;  %vm46_vm2 = vcmask 314424   ;;  %s559_s0 = smov 115   ;;  %s560_s29 = smov 116  }
   0x4   :  { %40 = vrot.lane.b32.xlu0 %v36_v1, %s557_s26  ;;  %32 = vst.msk [vmem:[#allocation2] sm:$0xf] %vm31_vm1, %v558_v4  ;;  %s561_s30 = smov 114   ;;  %s562_s8 = smov 118   ;;  %vm113_vm3 = vcmask 1043456   ;;  %vm171_vm4 = vcmask 982016  }
   0x5   :  { %30 = vst.msk [vmem:[#allocation2 + $0x4] sm:$0xf] %vm28_vm0, %v558_v4  ;;  %s563_s9 = smov 120   ;;  %s564_s10 = smov 119   ;;  %v170_v55 = vld [vmem:[%s780_s1] sm:$0xf] }
   0x6   :  { %257 = vst.msk [vmem:[#allocation3] sm:$0xf] %vm28_vm0, %v558_v4  ;;  %s565_s11 = smov 117   ;;  %s566_s12 = smov 121   ;;  %vm207_vm5 = vcmask 261120  }
   0x7   :  { %258 = vst.msk [vmem:[#allocation3 + $0x4] sm:$0xf] %vm28_vm0, %v558_v4  ;;  %s567_s13 = smov 124   ;;  %s568_s14 = smov 122  }
   0x8   :  { %33 = vst.msk [vmem:[#allocation2 + $0x4] sm:$0xf] %vm31_vm1, %v558_v4  ;;  %s569_s15 = smov 126   ;;  %s570_s16 = smov 125  }
   0x9   :  { %259 = vst.msk [vmem:[#allocation3] sm:$0xf] %vm31_vm1, %v558_v4  ;;  %s571_s17 = smov 123   ;;  %s572_s18 = smov 127  }
   0xa   :  { %260 = vst.msk [vmem:[#allocation3 + $0x4] sm:$0xf] %vm31_vm1, %v558_v4  ;;  %s573_s27 = smov [#allocation4]  }
   0xb   :  { %s488_s28 = sshll.u32 %s573_s27, 4  ;;  %s489_s28 = int_to_ptr.vmem [resolvable:$true] %s488_s28 }
   0xc   :  { %42 = vrot.lane.b32.xlu0 %v37_v3, %s557_s26 }
  0x76   :  { %v41_v5 = vpop.permute.xlu0 %40 }
  0x77   :  { %47 = vst.msk [vmem:[#allocation2] sm:$0xf] %vm46_vm2, %v41_v5 }
  0x7e   :  { %v633_v6 = vld [vmem:[#allocation2] sm:$0xf]  ;;  %v43_v7 = vpop.permute.xlu0 %42 }
  0x7f   :  { %v53_v8 = vunpack.c.l.b16 %v633_v6  ;;  %48 = vst.msk [vmem:[#allocation2 + $0x4] sm:$0xf] %vm46_vm2, %v43_v7 }
  0x81   :  { %v55_v9 = vpack.c.b16 %v53_v8, %v53_v8 }
  0x83   :  { %105 = vrot.lane.b32.xlu0 %v55_v9, %s559_s0  ;;  %101 = vrot.lane.b32.xlu2 %v55_v9, %s560_s29 }
  0x84   :  { %109 = vrot.lane.b32.xlu1 %v55_v9, %s561_s30 }
  0x86   :  { %v640_v10 = vld [vmem:[#allocation2 + $0x4] sm:$0xf] }
  0x87   :  { %v54_v11 = vunpack.c.l.b16 %v640_v10 }
  0x89   :  { %v56_v12 = vpack.c.b16 %v54_v11, %v54_v11 }
  0x8b   :  { %95 = vrot.lane.b32.xlu0 %v56_v12, %s562_s8  ;;  %103 = vrot.lane.b32.xlu2 %v56_v12, %s560_s29 }
  0x8c   :  { %111 = vrot.lane.b32.xlu1 %v56_v12, %s561_s30 }
  0x93   :  { %85 = vrot.lane.b32.xlu0 %v55_v9, %s563_s9  ;;  %93 = vrot.lane.b32.xlu2 %v55_v9, %s562_s8 }
  0x94   :  { %107 = vrot.lane.b32.xlu1 %v56_v12, %s559_s0 }
  0x9b   :  { %91 = vrot.lane.b32.xlu0 %v56_v12, %s564_s10  ;;  %99 = vrot.lane.b32.xlu2 %v56_v12, %s565_s11 }
  0x9c   :  { %97 = vrot.lane.b32.xlu1 %v55_v9, %s565_s11 }
  0xa3   :  { %81 = vrot.lane.b32.xlu0 %v55_v9, %s566_s12  ;;  %89 = vrot.lane.b32.xlu2 %v55_v9, %s564_s10 }
  0xa4   :  { %87 = vrot.lane.b32.xlu1 %v56_v12, %s563_s9 }
  0xab   :  { %71 = vrot.lane.b32.xlu0 %v56_v12, %s567_s13  ;;  %79 = vrot.lane.b32.xlu2 %v56_v12, %s568_s14 }
  0xac   :  { %77 = vrot.lane.b32.xlu1 %v55_v9, %s568_s14 }
  0xb3   :  { %61 = vrot.lane.b32.xlu0 %v55_v9, %s569_s15  ;;  %69 = vrot.lane.b32.xlu2 %v55_v9, %s567_s13 }
  0xb4   :  { %83 = vrot.lane.b32.xlu1 %v56_v12, %s566_s12 }
  0xbb   :  { %67 = vrot.lane.b32.xlu0 %v56_v12, %s570_s16  ;;  %75 = vrot.lane.b32.xlu2 %v56_v12, %s571_s17 }
  0xbc   :  { %73 = vrot.lane.b32.xlu1 %v55_v9, %s571_s17 }
  0xc3   :  { %65 = vrot.lane.b32.xlu2 %v55_v9, %s570_s16 }
  0xc4   :  { %63 = vrot.lane.b32.xlu1 %v56_v12, %s569_s15 }
  0xcb   :  { %59 = vrot.lane.b32.xlu2 %v56_v12, %s572_s18 }
  0xcc   :  { %57 = vrot.lane.b32.xlu1 %v55_v9, %s572_s18 }
  0xdd   :  { %v102_v13 = vpop.permute.xlu2 %101 }
  0xe5   :  { %v104_v14 = vpop.permute.xlu2 %103 }
  0xed   :  { %v94_v15 = vpop.permute.xlu2 %93 }
  0xf5   :  { %v106_v16 = vpop.permute.xlu0 %105  ;;  %v100_v20 = vpop.permute.xlu2 %99 }
  0xf6   :  { %v110_v17 = vpop.permute.xlu1 %109  ;;  %v164_v19 = vsel %vm113_vm3, %v102_v13, %v106_v16 }
  0xf7   :  { %v176_v18 = vsel %vm113_vm3, %v110_v17, 0 }
  0xf8   :  { %178 = vmatpush.bf16.msra.mxu0 %v176_v18 }
  0xfc   :  { %179 = vmatpush.bf16.msra.mxu0 %v164_v19 }
  0xfd   :  { %v96_v21 = vpop.permute.xlu0 %95  ;;  %v90_v25 = vpop.permute.xlu2 %89 }
  0xfe   :  { %v112_v22 = vpop.permute.xlu1 %111  ;;  %v160_v28 = vsel %vm113_vm3, %v96_v21, %v100_v20 }
  0xff   :  { %v192_v23 = vsel %vm113_vm3, %v112_v22, 0  ;;  %v236_v22 = vld [vmem:[%s782_s3] sm:$0xff] }
 0x100   :  { %194 = vmatpush.bf16.msra.mxu1 %v192_v23 }
 0x105   :  { %v86_v24 = vpop.permute.xlu0 %85  ;;  %v80_v32 = vpop.permute.xlu2 %79 }
 0x106   :  { %v108_v26 = vpop.permute.xlu1 %107  ;;  %v148_v33 = vsel %vm113_vm3, %v86_v24, %v90_v25 }
 0x107   :  { %v168_v27 = vsel %vm113_vm3, %v104_v14, %v108_v26  ;;  %v238_v26 = vld [vmem:[%s783_s4] sm:$0xff] }
 0x108   :  { %195 = vmatpush.bf16.msra.mxu1 %v168_v27 }
 0x10c   :  { %196 = vmatpush.bf16.msra.mxu1 %v160_v28 }
 0x10d   :  { %v92_v29 = vpop.permute.xlu0 %91  ;;  %v70_v37 = vpop.permute.xlu2 %69 }
 0x10e   :  { %v98_v30 = vpop.permute.xlu1 %97 }
 0x10f   :  { %v156_v31 = vsel %vm113_vm3, %v94_v15, %v98_v30 }
 0x110   :  { %180 = vmatpush.bf16.msra.mxu0 %v156_v31 }
 0x114   :  { %181 = vmatpush.bf16.msra.mxu0 %v148_v33 }
 0x115   :  { %v82_v36 = vpop.permute.xlu0 %81  ;;  %v76_v41 = vpop.permute.xlu2 %75 }
 0x116   :  { %v88_v34 = vpop.permute.xlu1 %87 }
 0x117   :  { %v152_v35 = vsel %vm113_vm3, %v88_v34, %v92_v29 }
 0x118   :  { %197 = vmatpush.bf16.msra.mxu1 %v152_v35 }
 0x11d   :  { %v72_v40 = vpop.permute.xlu0 %71  ;;  %v66_v46 = vpop.permute.xlu2 %65 }
 0x11e   :  { %v78_v38 = vpop.permute.xlu1 %77  ;;  %v136_v44 = vsel %vm113_vm3, %v72_v40, %v76_v41 }
 0x11f   :  { %v140_v39 = vsel %vm113_vm3, %v78_v38, %v82_v36 }
 0x120   :  { %182 = vmatpush.bf16.msra.mxu0 %v140_v39 }
 0x125   :  { %v62_v45 = vpop.permute.xlu0 %61  ;;  %v60_v53 = vpop.permute.xlu2 %59 }
 0x126   :  { %v84_v42 = vpop.permute.xlu1 %83  ;;  %v124_v49 = vsel %vm113_vm3, %v62_v45, %v66_v46  ;;  %v120_v54 = vsel %vm113_vm3, %v640_v10, %v60_v53 }
 0x127   :  { %v144_v43 = vsel %vm113_vm3, %v80_v32, %v84_v42 }
 0x128   :  { %198 = vmatpush.bf16.msra.mxu1 %v144_v43 }
 0x12c   :  { %199 = vmatpush.bf16.msra.mxu1 %v136_v44 }
 0x12d   :  { %v68_v50 = vpop.permute.xlu0 %67 }
 0x12e   :  { %v74_v47 = vpop.permute.xlu1 %73 }
 0x12f   :  { %v132_v48 = vsel %vm113_vm3, %v70_v37, %v74_v47 }
 0x130   :  { %183 = vmatpush.bf16.msra.mxu0 %v132_v48 }
 0x134   :  { %184 = vmatpush.bf16.msra.mxu0 %v124_v49 }
 0x136   :  { %v64_v51 = vpop.permute.xlu1 %63 }
 0x137   :  { %v128_v52 = vsel %vm113_vm3, %v64_v51, %v68_v50 }
 0x138   :  { %200 = vmatpush.bf16.msra.mxu1 %v128_v52 }
 0x13c   :  { %201 = vmatpush.bf16.msra.mxu1 %v120_v54 }
 0x13e   :  { %v58_v56 = vpop.permute.xlu1 %57 }
 0x13f   :  { %503 = vmatmul.msk.bf16.vlgmr.msra.gmra.mxu1 %vm171_vm4, %v170_v55  ;;  %v116_v57 = vsel %vm113_vm3, %v633_v6, %v58_v56 }
 0x140   :  { %185 = vmatpush.bf16.msra.mxu0 %v116_v57 }
 0x143   :  { %502 = vmatmul.msk.bf16.vlgmr.msra.gmra.mxu0 %vm171_vm4, %v170_v55 }
 0x1bc   :  { %v203_v58 = vpop.f32.mrf.mxu1 }
 0x1bd   :  { %v214_v59 = vmul.f32 %v203_v58, %v203_v58  ;;  %v209_v60 = vsel %vm207_vm5, %v203_v58, 0.0 }
 0x1bf   :  { %v216_v1 = vsel %vm207_vm5, %v214_v59, 0.0 }
 0x1c0   :  { %v187_v61 = vpop.f32.mrf.mxu0 }
 0x1c1   :  { %v213_v62 = vmul.f32 %v187_v61, %v187_v61  ;;  %v208_v63 = vsel %vm207_vm5, %v187_v61, 0.0 }
 0x1c2   :  { %v210_v3 = vadd.f32 %v209_v60, %v208_v63 }
 0x1c3   :  { %v215_v4 = vsel %vm207_vm5, %v213_v62, 0.0 }
 0x1c4   :  { %v205_v5 = vpop.f32.mrf.mxu1  ;;  %211 = vadd.xlane.f32.xlu0 %v210_v3  ;;  %v217_v6 = vadd.f32 %v216_v1, %v215_v4 }
 0x1c6   :  { %218 = vadd.xlane.f32.xlu1 %v217_v6 }
 0x1c8   :  { %v189_v7 = vpop.f32.mrf.mxu0 }
 0x237   :  { %v212_v8 = vpop.xlane.xlu0 %211 }
 0x238   :  { %v220_v9 = vmul.f32 0.015625, %v212_v8 }
 0x239   :  { %v219_v10 = vpop.xlane.xlu1 %218 }
 0x23a   :  { %v222_v11 = vmul.f32 %v220_v9, %v220_v9  ;;  %v221_v12 = vmul.f32 0.015625, %v219_v10 }
 0x23c   :  { %v223_v13 = vsub.f32 %v221_v12, %v222_v11 }
 0x23e   :  { %v224_v14 = vmax.f32 %v223_v13, 0.0 }
 0x240   :  { %v225_v15 = vadd.f32 1e-05, %v224_v14 }
 0x242   :  { %527 = vrsqrt.f32 %v225_v15  ;;  %vm232_vm7 = vweird.f32 %v225_v15 }
 0x248   :  { %v528_v16 = vpop.eup %527 }
 0x249   :  { %v227_v17 = vmul.f32 %v528_v16, %v225_v15  ;;  %vm233_vm6 = vweird.f32 %v528_v16 }
 0x24a   :  { %vm234_vm8 = vmor %vm232_vm7, %vm233_vm6 }
 0x24b   :  { %v228_v18 = vmul.f32 %v528_v16, %v227_v17 }
 0x24d   :  { %v229_v19 = vmul.f32 0.5, %v228_v18 }
 0x24f   :  { %v230_v20 = vsub.f32 1.5, %v229_v19 }
 0x251   :  { %v231_v21 = vmul.f32 %v528_v16, %v230_v20 }
 0x253   :  { %v235_v23 = vsel %vm234_vm8, %v528_v16, %v231_v21 }
 0x254   :  { %v237_v24 = vmul.f32 %v236_v22, %v235_v23 }
 0x256   :  { %243 = vperm.xlu2 %525, %v237_v24   ;;  %v239_v25 = vmul.f32 %v237_v24, %v220_v9 }
 0x258   :  { %v240_v27 = vsub.f32 %v238_v26, %v239_v25 }
 0x25e   :  { %250 = vperm.xlu2 %525, %v240_v27  }
 0x2b0   :  { %v244_v28 = vpop.permute.xlu2 %243 }
 0x2b1   :  { %v246_v29 = vmul.f32 %v244_v28, %v187_v61  ;;  %v247_v32 = vmul.f32 %v244_v28, %v203_v58  ;;  %v393_v28 = vld [vmem:[%s781_s2] sm:$0xf] }
 0x2b8   :  { %v251_v30 = vpop.permute.xlu2 %250 }
 0x2b9   :  { %v253_v31 = vadd.f32 %v251_v30, %v246_v29  ;;  %v254_v34 = vadd.f32 %v251_v30, %v247_v32 }
 0x2bb   :  { %v255_v33 = vmax.f32 %v253_v31, 0.0  ;;  %v256_v36 = vmax.f32 %v254_v34, 0.0 }
 0x2bd   :  { %v261_v35 = vpack.c.bf16 %v255_v33, %v255_v33  ;;  %v262_v37 = vpack.c.bf16 %v256_v36, %v256_v36 }
 0x2bf   :  { %265 = vrot.lane.b32.xlu2 %v261_v35, %s557_s26 }
 0x2c7   :  { %267 = vrot.lane.b32.xlu2 %v262_v37, %s557_s26 }
 0x319   :  { %v266_v38 = vpop.permute.xlu2 %265 }
 0x31a   :  { %271 = vst.msk [vmem:[#allocation3] sm:$0xf] %vm46_vm2, %v266_v38 }
 0x321   :  { %v704_v39 = vld [vmem:[#allocation3] sm:$0xf]  ;;  %v268_v40 = vpop.permute.xlu2 %267 }
 0x322   :  { %v277_v41 = vunpack.c.l.b16 %v704_v39  ;;  %272 = vst.msk [vmem:[#allocation3 + $0x4] sm:$0xf] %vm46_vm2, %v268_v40 }
 0x324   :  { %v279_v42 = vpack.c.b16 %v277_v41, %v277_v41 }
 0x326   :  { %325 = vrot.lane.b32.xlu0 %v279_v42, %s560_s29  ;;  %333 = vrot.lane.b32.xlu2 %v279_v42, %s561_s30 }
 0x329   :  { %v710_v43 = vld [vmem:[#allocation3 + $0x4] sm:$0xf] }
 0x32a   :  { %v278_v44 = vunpack.c.l.b16 %v710_v43 }
 0x32c   :  { %v280_v45 = vpack.c.b16 %v278_v44, %v278_v44 }
 0x32e   :  { %317 = vrot.lane.b32.xlu0 %v279_v42, %s562_s8  ;;  %327 = vrot.lane.b32.xlu1 %v280_v45, %s560_s29  ;;  %s490_s29 = sshll.u32 %s786_s7, 4  ;;  %s491_s29 = int_to_ptr.hbm [resolvable:$true] %s490_s29 }
 0x32f   :  { %335 = vrot.lane.b32.xlu2 %v280_v45, %s561_s30  ;;  %s575_s30 = smov 8  }
 0x336   :  { %323 = vrot.lane.b32.xlu0 %v280_v45, %s565_s11  ;;  %321 = vrot.lane.b32.xlu1 %v279_v42, %s565_s11 }
 0x337   :  { %329 = vrot.lane.b32.xlu2 %v279_v42, %s559_s0 }
 0x33e   :  { %313 = vrot.lane.b32.xlu0 %v279_v42, %s564_s10  ;;  %311 = vrot.lane.b32.xlu1 %v280_v45, %s563_s9 }
 0x33f   :  { %331 = vrot.lane.b32.xlu2 %v280_v45, %s559_s0 }
 0x346   :  { %303 = vrot.lane.b32.xlu0 %v280_v45, %s568_s14  ;;  %301 = vrot.lane.b32.xlu1 %v279_v42, %s568_s14 }
 0x347   :  { %319 = vrot.lane.b32.xlu2 %v280_v45, %s562_s8 }
 0x34e   :  { %293 = vrot.lane.b32.xlu0 %v279_v42, %s567_s13  ;;  %307 = vrot.lane.b32.xlu1 %v280_v45, %s566_s12 }
 0x34f   :  { %309 = vrot.lane.b32.xlu2 %v279_v42, %s563_s9 }
 0x356   :  { %299 = vrot.lane.b32.xlu0 %v280_v45, %s571_s17  ;;  %297 = vrot.lane.b32.xlu1 %v279_v42, %s571_s17 }
 0x357   :  { %315 = vrot.lane.b32.xlu2 %v280_v45, %s564_s10 }
 0x35e   :  { %289 = vrot.lane.b32.xlu0 %v279_v42, %s570_s16  ;;  %287 = vrot.lane.b32.xlu1 %v280_v45, %s569_s15 }
 0x35f   :  { %305 = vrot.lane.b32.xlu2 %v279_v42, %s566_s12 }
 0x366   :  { %283 = vrot.lane.b32.xlu0 %v280_v45, %s572_s18  ;;  %281 = vrot.lane.b32.xlu1 %v279_v42, %s572_s18 }
 0x367   :  { %295 = vrot.lane.b32.xlu2 %v280_v45, %s567_s13 }
 0x36f   :  { %285 = vrot.lane.b32.xlu2 %v279_v42, %s569_s15 }
 0x377   :  { %291 = vrot.lane.b32.xlu2 %v280_v45, %s570_s16 }
 0x380   :  { %v334_v46 = vpop.permute.xlu2 %333 }
 0x381   :  { %v398_v47 = vsel %vm113_vm3, %v334_v46, 0 }
 0x382   :  { %400 = vmatpush.bf16.msra.mxu2 %v398_v47 }
 0x389   :  { %v336_v48 = vpop.permute.xlu2 %335 }
 0x38a   :  { %v414_v49 = vsel %vm113_vm3, %v336_v48, 0 }
 0x38b   :  { %416 = vmatpush.bf16.msra.mxu3 %v414_v49 }
 0x391   :  { %v330_v50 = vpop.permute.xlu2 %329 }
 0x398   :  { %v326_v51 = vpop.permute.xlu0 %325 }
 0x399   :  { %v332_v52 = vpop.permute.xlu2 %331  ;;  %v387_v53 = vsel %vm113_vm3, %v326_v51, %v330_v50 }
 0x39a   :  { %401 = vmatpush.bf16.msra.mxu2 %v387_v53 }
 0x3a0   :  { %v318_v54 = vpop.permute.xlu0 %317  ;;  %v328_v55 = vpop.permute.xlu1 %327 }
 0x3a1   :  { %v320_v56 = vpop.permute.xlu2 %319  ;;  %v391_v57 = vsel %vm113_vm3, %v328_v55, %v332_v52  ;;  %v457_v55 = vld [vmem:[%s784_s5] sm:$0xff] }
 0x3a2   :  { %417 = vmatpush.bf16.msra.mxu3 %v391_v57 }
 0x3a8   :  { %v324_v58 = vpop.permute.xlu0 %323  ;;  %v322_v59 = vpop.permute.xlu1 %321 }
 0x3a9   :  { %v310_v60 = vpop.permute.xlu2 %309  ;;  %v379_v61 = vsel %vm113_vm3, %v318_v54, %v322_v59  ;;  %v383_v62 = vsel %vm113_vm3, %v320_v56, %v324_v58  ;;  %v459_v59 = vld [vmem:[%s785_s6] sm:$0xff]  ;;  %s574_s6 = smov 128  }
 0x3aa   :  { %402 = vmatpush.bf16.msra.mxu2 %v379_v61  ;;  %418 = vmatpush.bf16.msra.mxu3 %v383_v62 }
 0x3b0   :  { %v314_v63 = vpop.permute.xlu0 %313  ;;  %v312_v1 = vpop.permute.xlu1 %311 }
 0x3b1   :  { %v316_v3 = vpop.permute.xlu2 %315  ;;  %v371_v4 = vsel %vm113_vm3, %v310_v60, %v314_v63 }
 0x3b2   :  { %403 = vmatpush.bf16.msra.mxu2 %v371_v4  ;;  %v375_v5 = vsel %vm113_vm3, %v312_v1, %v316_v3 }
 0x3b3   :  { %419 = vmatpush.bf16.msra.mxu3 %v375_v5 }
 0x3b8   :  { %v304_v6 = vpop.permute.xlu0 %303  ;;  %v302_v7 = vpop.permute.xlu1 %301 }
 0x3b9   :  { %v306_v8 = vpop.permute.xlu2 %305 }
 0x3ba   :  { %v363_v9 = vsel %vm113_vm3, %v302_v7, %v306_v8 }
 0x3bb   :  { %404 = vmatpush.bf16.msra.mxu2 %v363_v9 }
 0x3c0   :  { %v294_v10 = vpop.permute.xlu0 %293  ;;  %v308_v11 = vpop.permute.xlu1 %307 }
 0x3c1   :  { %v296_v12 = vpop.permute.xlu2 %295  ;;  %v367_v13 = vsel %vm113_vm3, %v304_v6, %v308_v11 }
 0x3c2   :  { %420 = vmatpush.bf16.msra.mxu3 %v367_v13 }
 0x3c8   :  { %v300_v14 = vpop.permute.xlu0 %299  ;;  %v298_v15 = vpop.permute.xlu1 %297 }
 0x3c9   :  { %v286_v16 = vpop.permute.xlu2 %285  ;;  %v355_v17 = vsel %vm113_vm3, %v294_v10, %v298_v15  ;;  %v359_v18 = vsel %vm113_vm3, %v296_v12, %v300_v14 }
 0x3ca   :  { %405 = vmatpush.bf16.msra.mxu2 %v355_v17  ;;  %421 = vmatpush.bf16.msra.mxu3 %v359_v18 }
 0x3d0   :  { %v290_v19 = vpop.permute.xlu0 %289  ;;  %v288_v20 = vpop.permute.xlu1 %287 }
 0x3d1   :  { %v292_v21 = vpop.permute.xlu2 %291  ;;  %v347_v22 = vsel %vm113_vm3, %v286_v16, %v290_v19 }
 0x3d2   :  { %406 = vmatpush.bf16.msra.mxu2 %v347_v22  ;;  %v351_v23 = vsel %vm113_vm3, %v288_v20, %v292_v21 }
 0x3d3   :  { %422 = vmatpush.bf16.msra.mxu3 %v351_v23 }
 0x3d8   :  { %v284_v24 = vpop.permute.xlu0 %283  ;;  %v282_v25 = vpop.permute.xlu1 %281 }
 0x3d9   :  { %v339_v26 = vsel %vm113_vm3, %v704_v39, %v282_v25  ;;  %v343_v27 = vsel %vm113_vm3, %v710_v43, %v284_v24 }
 0x3da   :  { %407 = vmatpush.bf16.msra.mxu2 %v339_v26  ;;  %423 = vmatpush.bf16.msra.mxu3 %v343_v27 }
 0x3dd   :  { %504 = vmatmul.msk.bf16.vlgmr.msra.gmra.mxu2 %vm171_vm4, %v393_v28  ;;  %505 = vmatmul.msk.bf16.vlgmr.msra.gmra.mxu3 %vm171_vm4, %v393_v28 }
 0x460   :  { %v409_v29 = vpop.f32.mrf.mxu2  ;;  %v425_v30 = vpop.f32.mrf.mxu3 }
 0x461   :  { %v434_v31 = vmul.f32 %v409_v29, %v409_v29  ;;  %v435_v32 = vmul.f32 %v425_v30, %v425_v30  ;;  %v429_v33 = vsel %vm207_vm5, %v409_v29, 0.0  ;;  %v430_v34 = vsel %vm207_vm5, %v425_v30, 0.0 }
 0x462   :  { %v431_v35 = vadd.f32 %v430_v34, %v429_v33 }
 0x463   :  { %v436_v36 = vsel %vm207_vm5, %v434_v31, 0.0  ;;  %v437_v37 = vsel %vm207_vm5, %v435_v32, 0.0 }
 0x464   :  { %432 = vadd.xlane.f32.xlu2 %v431_v35  ;;  %v438_v38 = vadd.f32 %v437_v37, %v436_v36 }
 0x466   :  { %439 = vadd.xlane.f32.xlu1 %v438_v38 }
 0x468   :  { %v411_v39 = vpop.f32.mrf.mxu2  ;;  %v427_v40 = vpop.f32.mrf.mxu3 }
 0x4d7   :  { %v433_v41 = vpop.xlane.xlu2 %432 }
 0x4d8   :  { %v441_v42 = vmul.f32 0.015625, %v433_v41 }
 0x4d9   :  { %v440_v43 = vpop.xlane.xlu1 %439 }
 0x4da   :  { %v443_v44 = vmul.f32 %v441_v42, %v441_v42  ;;  %v442_v45 = vmul.f32 0.015625, %v440_v43 }
 0x4dc   :  { %v444_v46 = vsub.f32 %v442_v45, %v443_v44 }
 0x4de   :  { %v445_v47 = vmax.f32 %v444_v46, 0.0 }
 0x4e0   :  { %v446_v48 = vadd.f32 1e-05, %v445_v47 }
 0x4e2   :  { %529 = vrsqrt.f32 %v446_v48  ;;  %vm453_vm10 = vweird.f32 %v446_v48 }
 0x4e8   :  { %v530_v49 = vpop.eup %529 }
 0x4e9   :  { %v448_v50 = vmul.f32 %v530_v49, %v446_v48  ;;  %vm454_vm9 = vweird.f32 %v530_v49 }
 0x4ea   :  { %vm455_vm11 = vmor %vm453_vm10, %vm454_vm9 }
 0x4eb   :  { %v449_v51 = vmul.f32 %v530_v49, %v448_v50 }
 0x4ed   :  { %v450_v52 = vmul.f32 0.5, %v449_v51 }
 0x4ef   :  { %v451_v53 = vsub.f32 1.5, %v450_v52 }
 0x4f1   :  { %v452_v54 = vmul.f32 %v530_v49, %v451_v53 }
 0x4f3   :  { %v456_v56 = vsel %vm455_vm11, %v530_v49, %v452_v54 }
 0x4f4   :  { %v458_v57 = vmul.f32 %v457_v55, %v456_v56 }
 0x4f6   :  { %464 = vperm.xlu0 %526, %v458_v57   ;;  %v460_v58 = vmul.f32 %v458_v57, %v441_v42 }
 0x4f8   :  { %v461_v60 = vsub.f32 %v459_v59, %v460_v58 }
 0x4fe   :  { %471 = vperm.xlu0 %526, %v461_v60  }
 0x568   :  { %v465_v61 = vpop.permute.xlu0 %464 }
 0x569   :  { %v467_v62 = vmul.f32 %v465_v61, %v409_v29  ;;  %v468_v63 = vmul.f32 %v465_v61, %v425_v30 }
 0x570   :  { %v472_v1 = vpop.permute.xlu0 %471 }
 0x571   :  { %v474_v3 = vadd.f32 %v472_v1, %v467_v62  ;;  %v475_v4 = vadd.f32 %v472_v1, %v468_v63 }
 0x573   :  { %v478_v5 = vadd.f32 %v474_v3, %v619_v0  ;;  %v479_v6 = vadd.f32 %v475_v4, %v627_v2 }
 0x575   :  { %v480_v7 = vmax.f32 %v478_v5, 0.0  ;;  %v481_v8 = vmax.f32 %v479_v6, 0.0 }
 0x577   :  { %482 = vst.msk [vmem:[#allocation4] sm:$0xff] %vm207_vm5, %v480_v7 }
 0x578   :  { %483 = vst.msk [vmem:[#allocation4 + $0x8] sm:$0xff] %vm207_vm5, %v481_v8 }
 0x579   :  { %496 = dma.vmem_to_hbm [thread:$0]  %s489_s28, 256, %s491_s29, [#allocation5], %s574_s6, %s574_s6, %s575_s30  }
 0x57a   :  { %555 = dma.done.wait [#allocation5], 256  }
 0x57b   :  { %556 = vsyncadd [#allocation5], 4294967040 }
 0x57c   :  { %501 = vsyncpa [#allocation5], 1 }

</bundles_post_ra>
